<compile_context>
chip_gen: v5e
topology: v5e:2x2
jax: 0.10.0
libtpu: 0.0.40
codegen_flags: <defaults>
</compile_context>

<pallas_src>
import jax
import jax.numpy as jnp
from jax import lax
from jax.experimental import pallas as pl
from jax.experimental.pallas import tpu as pltpu

HIDDEN_SIZE = 128   # fixed in the PyTorch module
LEAK = 0.3
LANES = 128
BATCH_TILE = 8      # one sublane group of batch rows per grid step


def _leaky(x):
    return jnp.where(x > 0, x, LEAK * x)


def _batch_pad(bsize):
    return max(BATCH_TILE,
               ((bsize + BATCH_TILE - 1) // BATCH_TILE) * BATCH_TILE)


def init_params(key, state_size, action_size):
    """Deterministic synthetic f32 parameters. Weights stored as (in, out)."""
    dims_adv = [(state_size, HIDDEN_SIZE), (HIDDEN_SIZE, 64), (64, 32),
                (32, action_size)]
    dims_val = [(HIDDEN_SIZE, 64), (64, 32), (32, 1)]
    params = []
    keys = jax.random.split(key, len(dims_adv) + len(dims_val))
    for k, (din, dout) in zip(keys, dims_adv + dims_val):
        scale = 1.0 / jnp.sqrt(jnp.float32(din))
        w = jax.random.normal(k, (din, dout), jnp.float32) * scale
        b = jnp.full((dout,), 0.01, jnp.float32)
        params.append((w, b))
    return params


def pack_params(params, action_size):
    """Pack the 7 Linear layers into two slabs.

    Weight slab (bf16, shape (5H, H)):
      rows 0:H    -> adv W1                       (128 -> 128)
      rows H:2H   -> adv W2 in cols 0:64          (128 -> 64)
      rows 2H:3H  -> val V1 in cols 64:128        (128 -> 64)
      rows 3H:4H  -> blockdiag(adv W3, val V2)    [adv32 | val32 | 0]
      rows 4H:5H  -> blockdiag(adv W4, val V3)    [adv(A) | val | 0]
    Bias slab (f32, shape (8, H)): one row per fused stage (4 used, 4 zero
    padding rows); broadcast across sublanes in-kernel (no replication).
    Zero-padded columns stay zero through LeakyReLU, so padding is exact.
    """
    H = HIDDEN_SIZE
    A = action_size
    (aw1, ab1), (aw2, ab2), (aw3, ab3), (aw4, ab4), \
        (vw1, vb1), (vw2, vb2), (vw3, vb3) = params

    s1 = aw1                                                      # (128, 128)
    s2 = jnp.zeros((H, H), jnp.float32).at[:, 0:64].set(aw2)
    s3 = jnp.zeros((H, H), jnp.float32).at[:, 64:128].set(vw1)
    s4 = jnp.zeros((H, H), jnp.float32)
    s4 = s4.at[0:64, 0:32].set(aw3).at[64:128, 32:64].set(vw2)
    s5 = jnp.zeros((H, H), jnp.float32)
    s5 = s5.at[0:32, 0:A].set(aw4).at[32:64, A:A + 1].set(vw3)
    w_slab = jnp.concatenate([s1, s2, s3, s4, s5],
                             axis=0).astype(jnp.bfloat16)         # (640, 128)

    def brow(*parts):
        row = jnp.zeros((H,), jnp.float32)
        off = 0
        for p in parts:
            p = p.reshape(-1)
            row = row.at[off:off + p.shape[0]].set(p)
            off += p.shape[0]
        return row

    b_slab = jnp.zeros((8, H), jnp.float32)
    b_slab = b_slab.at[0].set(brow(ab1))
    b_slab = b_slab.at[1].set(brow(ab2, vb1))
    b_slab = b_slab.at[2].set(brow(ab3, vb2))
    b_slab = b_slab.at[3].set(brow(ab4, vb3))
    return w_slab, b_slab


def _make_kernel(state_size, action_size, max_t):
    H = HIDDEN_SIZE
    A = action_size
    D = state_size
    T = max_t
    BT = BATCH_TILE
    assert D == H, "val head applies Linear(128, 64) directly to the features"

    def kernel(len_ref, x_ref, w_ref, b_ref, q_ref):
        # len_ref: (b_pad,) int32 in SMEM (whole array)
        # x_ref  : (BT, T, D) f32 batch tile in VMEM
        # w_ref  : (5H, H) bf16 weight slab, b_ref: (8, H) f32 bias slab
        # q_ref  : (BT, LANES) f32 lane-dense output tile
        base = pl.program_id(0) * BT

        # ---- in-VMEM gather of padded_x[b, lengths[b]-1, :] (no extra DMA) ----
        sub = lax.broadcasted_iota(jnp.int32, (T, D), 0)
        rows = []
        for r in range(BT):
            t = jnp.maximum(len_ref[base + r] - 1, 0)   # guard length == 0
            xb = x_ref[r]                               # (T, D) f32
            rows.append(jnp.sum(jnp.where(sub == t, xb, 0.0),
                                axis=0, keepdims=True))
        # TODO(synk): for very large batch tiles, replace this unrolled per-row
        # select-reduce with a vectorized / pl.Element-based gather.
        x = jnp.concatenate(rows, axis=0)               # (BT, D) f32

        def mm(act, row_off):
            # bf16 MXU matmul, f32 accumulate; elementwise math stays f32.
            return jnp.dot(act.astype(jnp.bfloat16),
                           w_ref[pl.ds(row_off, H), :],
                           preferred_element_type=jnp.float32)

        def bias(k):
            return b_ref[pl.ds(k, 1), :]                # (1, H), sublane-broadcast

        # stage 1: adv Linear(128,128)+LeakyReLU ; val path starts as leaky(x)
        h1 = _leaky(mm(x, 0) + bias(0))
        vx = _leaky(x)
        # stage 2: two K=128 matmuls (adv 128->64 | val 128->64), f32 accumulate
        h2 = _leaky(mm(h1, H) + mm(vx, 2 * H) + bias(1))      # [adv64 | val64]
        # stage 3: blockdiag(adv 64->32 | val 64->32)
        h3 = _leaky(mm(h2, 3 * H) + bias(2))                  # [adv32 | val32 | 0]
        # stage 4: blockdiag(adv 32->A | val 32->1)
        h4 = mm(h3, 4 * H) + bias(3)                          # [adv(A) | val | 0]

        # dueling combine, lane-masked so everything stays 128 lanes wide;
        # the mean is over the TRUE A lanes only.
        col = lax.broadcasted_iota(jnp.int32, h4.shape, 1)
        adv = jnp.where(col < A, h4, 0.0)
        adv_mean = jnp.sum(adv, axis=1, keepdims=True) * (1.0 / A)
        val = jnp.sum(jnp.where(col == A, h4, 0.0), axis=1, keepdims=True)
        q_ref[...] = jnp.where(col < A, adv - adv_mean + val, 0.0)

    return kernel


def dueling_dqn_forward(padded_x, lengths, w_slab, b_slab, bsize, action_size):
    """padded_x: (B, T, D) f32 padded sequences; lengths: (B,) int32.
    Returns (qout of shape (B, A), 42) like the PyTorch forward."""
    B, T, D = padded_x.shape
    assert B == bsize
    b_pad = _batch_pad(bsize)
    if B < b_pad:
        padded_x = jnp.pad(padded_x, ((0, b_pad - B), (0, 0), (0, 0)))
        lengths = jnp.pad(lengths, (0, b_pad - B), constant_values=1)
    lengths = lengths.astype(jnp.int32)

    # TODO(synk): for very long sequence buffers that would not fit VMEM
    # (budget ~16-32 MiB on v7x's 64 MiB), fall back to memory_space=pl.ANY
    # for padded_x + manual make_async_copy row gather.
    kernel = _make_kernel(D, action_size, T)
    vmem = pltpu.MemorySpace.VMEM
    q_pad = pl.pallas_call(
        kernel,
        out_shape=jax.ShapeDtypeStruct((b_pad, LANES), jnp.float32),
        grid=(b_pad // BATCH_TILE,),
        in_specs=[
            pl.BlockSpec(memory_space=pltpu.MemorySpace.SMEM),       # lengths
            pl.BlockSpec((BATCH_TILE, T, D), lambda i: (i, 0, 0)),   # x tile
            pl.BlockSpec(memory_space=vmem),                         # weight slab
            pl.BlockSpec(memory_space=vmem),                         # bias slab
        ],
        out_specs=pl.BlockSpec((BATCH_TILE, LANES), lambda i: (i, 0)),
        compiler_params=pltpu.CompilerParams(
            dimension_semantics=("parallel",)),                      # v7x dual-TC
    )(lengths, padded_x, w_slab, b_slab)
    return q_pad[:bsize, :action_size], 42


def reference_forward(padded_x, lengths, params):
    """Plain-JAX f32 reference mirroring the PyTorch forward."""
    b_idx = jnp.arange(padded_x.shape[0])
    out = padded_x[b_idx, lengths - 1]
    (aw1, ab1), (aw2, ab2), (aw3, ab3), (aw4, ab4), \
        (vw1, vb1), (vw2, vb2), (vw3, vb3) = params
    h = _leaky(out @ aw1 + ab1)
    h = _leaky(h @ aw2 + ab2)
    h = _leaky(h @ aw3 + ab3)
    adv = h @ aw4 + ab4
    v = _leaky(out)
    v = _leaky(v @ vw1 + vb1)
    v = _leaky(v @ vw2 + vb2)
    val = v @ vw3 + vb3
    return val + (adv - adv.mean(axis=1, keepdims=True))


if __name__ == "__main__":
    key = jax.random.PRNGKey(0)
    k_x, k_p = jax.random.split(key)

    # state_size must equal 128 for the val path (Linear(128, 64) applied to
    # the raw features), exactly as in the PyTorch module.
    state_size = HIDDEN_SIZE
    action_size = 8
    bsize = 2
    max_T = 8

    padded_x = jax.random.normal(k_x, (bsize, max_T, state_size), jnp.float32)
    lengths = jnp.array([max_T, max_T - 3], dtype=jnp.int32)
    # zero out padding like pad_sequence(padding_value=0) would
    t_idx = jnp.arange(max_T)[None, :, None]
    padded_x = jnp.where(t_idx < lengths[:, None, None], padded_x, 0.0)

    params = init_params(k_p, state_size, action_size)
    w_slab, b_slab = pack_params(params, action_size)

    qout, const = dueling_dqn_forward(padded_x, lengths, w_slab, b_slab,
                                      bsize, action_size)
    qout = jax.block_until_ready(qout)

    q_ref = reference_forward(padded_x, lengths, params)
    assert qout.shape == (bsize, action_size)
    assert const == 42
    # Tolerance covers bf16 weight / MXU-operand rounding vs. the f32 reference.
    assert jnp.allclose(qout, q_ref, atol=5e-2, rtol=5e-2), \
        float(jnp.max(jnp.abs(qout - q_ref)))

    # TODO(synk): self.lstm_layer is defined in __init__ but unused in
    # forward(), so no LSTM kernel is emitted.
    print("KERNEL_OK")
</pallas_src>

<mosaic_0001>
module attributes {stable_mosaic.version = 11 : i64} {
  func.func @kernel(%arg0: i32, %arg1: memref<8xi32, #tpu.memory_space<smem>>, %arg2: memref<8x8x128xf32, #tpu.memory_space<vmem>>, %arg3: memref<640x128xbf16, #tpu.memory_space<vmem>>, %arg4: memref<8x128xf32, #tpu.memory_space<vmem>>, %arg5: memref<8x128xf32, #tpu.memory_space<vmem>>) attributes {dimension_semantics = [#tpu.dimension_semantics<parallel>], iteration_bounds = array<i64: 1>, scalar_prefetch = 0 : i64, scratch_operands = 0 : i64, tpu.core_type = #tpu.core_type<tc>, window_params = [{transform_indices = @transform_0, window_bounds = array<i64: 8>}, {transform_indices = @transform_1, window_bounds = array<i64: 8, 8, 128>}, {pipeline_mode = #tpu.pipeline_mode<synchronous>, transform_indices = @transform_2, window_bounds = array<i64: 640, 128>}, {pipeline_mode = #tpu.pipeline_mode<synchronous>, transform_indices = @transform_3, window_bounds = array<i64: 8, 128>}, {transform_indices = @transform_4, window_bounds = array<i64: 8, 128>}]} {
    %c8_i32 = arith.constant 8 : i32
    %0 = arith.muli %arg0, %c8_i32 : i32
    %1 = tpu.iota {dimensions = array<i32: 0>} : vector<8x128xi32>
    %c0_i32 = arith.constant 0 : i32
    %2 = arith.addi %0, %c0_i32 : i32
    %3 = arith.index_cast %2 : i32 to index
    %4 = memref.load %arg1[%3] : memref<8xi32, #tpu.memory_space<smem>>
    %c1_i32 = arith.constant 1 : i32
    %5 = arith.subi %4, %c1_i32 : i32
    %c0_i32_0 = arith.constant 0 : i32
    %6 = arith.maxsi %5, %c0_i32_0 : i32
    %c0 = arith.constant 0 : index
    %c0_1 = arith.constant 0 : index
    %c0_2 = arith.constant 0 : index
    %7 = vector.load %arg2[%c0, %c0_1, %c0_2] : memref<8x8x128xf32, #tpu.memory_space<vmem>>, vector<1x8x128xf32>
    %8 = vector.shape_cast %7 : vector<1x8x128xf32> to vector<8x128xf32>
    %9 = vector.broadcast %6 : i32 to vector<8x128xi32>
    %10 = arith.cmpi eq, %1, %9 : vector<8x128xi32>
    %cst = arith.constant 0.000000e+00 : f32
    %11 = vector.broadcast %cst : f32 to vector<8x128xf32>
    %12 = arith.select %10, %8, %11 : vector<8x128xi1>, vector<8x128xf32>
    %cst_3 = arith.constant dense<0.000000e+00> : vector<128xf32>
    %13 = vector.multi_reduction <add>, %12, %cst_3 [0] : vector<8x128xf32> to vector<128xf32>
    %14 = vector.shape_cast %13 : vector<128xf32> to vector<1x128xf32>
    %c1_i32_4 = arith.constant 1 : i32
    %15 = arith.addi %0, %c1_i32_4 : i32
    %16 = arith.index_cast %15 : i32 to index
    %17 = memref.load %arg1[%16] : memref<8xi32, #tpu.memory_space<smem>>
    %c1_i32_5 = arith.constant 1 : i32
    %18 = arith.subi %17, %c1_i32_5 : i32
    %c0_i32_6 = arith.constant 0 : i32
    %19 = arith.maxsi %18, %c0_i32_6 : i32
    %c1 = arith.constant 1 : index
    %c0_7 = arith.constant 0 : index
    %c0_8 = arith.constant 0 : index
    %20 = vector.load %arg2[%c1, %c0_7, %c0_8] : memref<8x8x128xf32, #tpu.memory_space<vmem>>, vector<1x8x128xf32>
    %21 = vector.shape_cast %20 : vector<1x8x128xf32> to vector<8x128xf32>
    %22 = vector.broadcast %19 : i32 to vector<8x128xi32>
    %23 = arith.cmpi eq, %1, %22 : vector<8x128xi32>
    %cst_9 = arith.constant 0.000000e+00 : f32
    %24 = vector.broadcast %cst_9 : f32 to vector<8x128xf32>
    %25 = arith.select %23, %21, %24 : vector<8x128xi1>, vector<8x128xf32>
    %cst_10 = arith.constant dense<0.000000e+00> : vector<128xf32>
    %26 = vector.multi_reduction <add>, %25, %cst_10 [0] : vector<8x128xf32> to vector<128xf32>
    %27 = vector.shape_cast %26 : vector<128xf32> to vector<1x128xf32>
    %c2_i32 = arith.constant 2 : i32
    %28 = arith.addi %0, %c2_i32 : i32
    %29 = arith.index_cast %28 : i32 to index
    %30 = memref.load %arg1[%29] : memref<8xi32, #tpu.memory_space<smem>>
    %c1_i32_11 = arith.constant 1 : i32
    %31 = arith.subi %30, %c1_i32_11 : i32
    %c0_i32_12 = arith.constant 0 : i32
    %32 = arith.maxsi %31, %c0_i32_12 : i32
    %c2 = arith.constant 2 : index
    %c0_13 = arith.constant 0 : index
    %c0_14 = arith.constant 0 : index
    %33 = vector.load %arg2[%c2, %c0_13, %c0_14] : memref<8x8x128xf32, #tpu.memory_space<vmem>>, vector<1x8x128xf32>
    %34 = vector.shape_cast %33 : vector<1x8x128xf32> to vector<8x128xf32>
    %35 = vector.broadcast %32 : i32 to vector<8x128xi32>
    %36 = arith.cmpi eq, %1, %35 : vector<8x128xi32>
    %cst_15 = arith.constant 0.000000e+00 : f32
    %37 = vector.broadcast %cst_15 : f32 to vector<8x128xf32>
    %38 = arith.select %36, %34, %37 : vector<8x128xi1>, vector<8x128xf32>
    %cst_16 = arith.constant dense<0.000000e+00> : vector<128xf32>
    %39 = vector.multi_reduction <add>, %38, %cst_16 [0] : vector<8x128xf32> to vector<128xf32>
    %40 = vector.shape_cast %39 : vector<128xf32> to vector<1x128xf32>
    %c3_i32 = arith.constant 3 : i32
    %41 = arith.addi %0, %c3_i32 : i32
    %42 = arith.index_cast %41 : i32 to index
    %43 = memref.load %arg1[%42] : memref<8xi32, #tpu.memory_space<smem>>
    %c1_i32_17 = arith.constant 1 : i32
    %44 = arith.subi %43, %c1_i32_17 : i32
    %c0_i32_18 = arith.constant 0 : i32
    %45 = arith.maxsi %44, %c0_i32_18 : i32
    %c3 = arith.constant 3 : index
    %c0_19 = arith.constant 0 : index
    %c0_20 = arith.constant 0 : index
    %46 = vector.load %arg2[%c3, %c0_19, %c0_20] : memref<8x8x128xf32, #tpu.memory_space<vmem>>, vector<1x8x128xf32>
    %47 = vector.shape_cast %46 : vector<1x8x128xf32> to vector<8x128xf32>
    %48 = vector.broadcast %45 : i32 to vector<8x128xi32>
    %49 = arith.cmpi eq, %1, %48 : vector<8x128xi32>
    %cst_21 = arith.constant 0.000000e+00 : f32
    %50 = vector.broadcast %cst_21 : f32 to vector<8x128xf32>
    %51 = arith.select %49, %47, %50 : vector<8x128xi1>, vector<8x128xf32>
    %cst_22 = arith.constant dense<0.000000e+00> : vector<128xf32>
    %52 = vector.multi_reduction <add>, %51, %cst_22 [0] : vector<8x128xf32> to vector<128xf32>
    %53 = vector.shape_cast %52 : vector<128xf32> to vector<1x128xf32>
    %c4_i32 = arith.constant 4 : i32
    %54 = arith.addi %0, %c4_i32 : i32
    %55 = arith.index_cast %54 : i32 to index
    %56 = memref.load %arg1[%55] : memref<8xi32, #tpu.memory_space<smem>>
    %c1_i32_23 = arith.constant 1 : i32
    %57 = arith.subi %56, %c1_i32_23 : i32
    %c0_i32_24 = arith.constant 0 : i32
    %58 = arith.maxsi %57, %c0_i32_24 : i32
    %c4 = arith.constant 4 : index
    %c0_25 = arith.constant 0 : index
    %c0_26 = arith.constant 0 : index
    %59 = vector.load %arg2[%c4, %c0_25, %c0_26] : memref<8x8x128xf32, #tpu.memory_space<vmem>>, vector<1x8x128xf32>
    %60 = vector.shape_cast %59 : vector<1x8x128xf32> to vector<8x128xf32>
    %61 = vector.broadcast %58 : i32 to vector<8x128xi32>
    %62 = arith.cmpi eq, %1, %61 : vector<8x128xi32>
    %cst_27 = arith.constant 0.000000e+00 : f32
    %63 = vector.broadcast %cst_27 : f32 to vector<8x128xf32>
    %64 = arith.select %62, %60, %63 : vector<8x128xi1>, vector<8x128xf32>
    %cst_28 = arith.constant dense<0.000000e+00> : vector<128xf32>
    %65 = vector.multi_reduction <add>, %64, %cst_28 [0] : vector<8x128xf32> to vector<128xf32>
    %66 = vector.shape_cast %65 : vector<128xf32> to vector<1x128xf32>
    %c5_i32 = arith.constant 5 : i32
    %67 = arith.addi %0, %c5_i32 : i32
    %68 = arith.index_cast %67 : i32 to index
    %69 = memref.load %arg1[%68] : memref<8xi32, #tpu.memory_space<smem>>
    %c1_i32_29 = arith.constant 1 : i32
    %70 = arith.subi %69, %c1_i32_29 : i32
    %c0_i32_30 = arith.constant 0 : i32
    %71 = arith.maxsi %70, %c0_i32_30 : i32
    %c5 = arith.constant 5 : index
    %c0_31 = arith.constant 0 : index
    %c0_32 = arith.constant 0 : index
    %72 = vector.load %arg2[%c5, %c0_31, %c0_32] : memref<8x8x128xf32, #tpu.memory_space<vmem>>, vector<1x8x128xf32>
    %73 = vector.shape_cast %72 : vector<1x8x128xf32> to vector<8x128xf32>
    %74 = vector.broadcast %71 : i32 to vector<8x128xi32>
    %75 = arith.cmpi eq, %1, %74 : vector<8x128xi32>
    %cst_33 = arith.constant 0.000000e+00 : f32
    %76 = vector.broadcast %cst_33 : f32 to vector<8x128xf32>
    %77 = arith.select %75, %73, %76 : vector<8x128xi1>, vector<8x128xf32>
    %cst_34 = arith.constant dense<0.000000e+00> : vector<128xf32>
    %78 = vector.multi_reduction <add>, %77, %cst_34 [0] : vector<8x128xf32> to vector<128xf32>
    %79 = vector.shape_cast %78 : vector<128xf32> to vector<1x128xf32>
    %c6_i32 = arith.constant 6 : i32
    %80 = arith.addi %0, %c6_i32 : i32
    %81 = arith.index_cast %80 : i32 to index
    %82 = memref.load %arg1[%81] : memref<8xi32, #tpu.memory_space<smem>>
    %c1_i32_35 = arith.constant 1 : i32
    %83 = arith.subi %82, %c1_i32_35 : i32
    %c0_i32_36 = arith.constant 0 : i32
    %84 = arith.maxsi %83, %c0_i32_36 : i32
    %c6 = arith.constant 6 : index
    %c0_37 = arith.constant 0 : index
    %c0_38 = arith.constant 0 : index
    %85 = vector.load %arg2[%c6, %c0_37, %c0_38] : memref<8x8x128xf32, #tpu.memory_space<vmem>>, vector<1x8x128xf32>
    %86 = vector.shape_cast %85 : vector<1x8x128xf32> to vector<8x128xf32>
    %87 = vector.broadcast %84 : i32 to vector<8x128xi32>
    %88 = arith.cmpi eq, %1, %87 : vector<8x128xi32>
    %cst_39 = arith.constant 0.000000e+00 : f32
    %89 = vector.broadcast %cst_39 : f32 to vector<8x128xf32>
    %90 = arith.select %88, %86, %89 : vector<8x128xi1>, vector<8x128xf32>
    %cst_40 = arith.constant dense<0.000000e+00> : vector<128xf32>
    %91 = vector.multi_reduction <add>, %90, %cst_40 [0] : vector<8x128xf32> to vector<128xf32>
    %92 = vector.shape_cast %91 : vector<128xf32> to vector<1x128xf32>
    %c7_i32 = arith.constant 7 : i32
    %93 = arith.addi %0, %c7_i32 : i32
    %94 = arith.index_cast %93 : i32 to index
    %95 = memref.load %arg1[%94] : memref<8xi32, #tpu.memory_space<smem>>
    %c1_i32_41 = arith.constant 1 : i32
    %96 = arith.subi %95, %c1_i32_41 : i32
    %c0_i32_42 = arith.constant 0 : i32
    %97 = arith.maxsi %96, %c0_i32_42 : i32
    %c7 = arith.constant 7 : index
    %c0_43 = arith.constant 0 : index
    %c0_44 = arith.constant 0 : index
    %98 = vector.load %arg2[%c7, %c0_43, %c0_44] : memref<8x8x128xf32, #tpu.memory_space<vmem>>, vector<1x8x128xf32>
    %99 = vector.shape_cast %98 : vector<1x8x128xf32> to vector<8x128xf32>
    %100 = vector.broadcast %97 : i32 to vector<8x128xi32>
    %101 = arith.cmpi eq, %1, %100 : vector<8x128xi32>
    %cst_45 = arith.constant 0.000000e+00 : f32
    %102 = vector.broadcast %cst_45 : f32 to vector<8x128xf32>
    %103 = arith.select %101, %99, %102 : vector<8x128xi1>, vector<8x128xf32>
    %cst_46 = arith.constant dense<0.000000e+00> : vector<128xf32>
    %104 = vector.multi_reduction <add>, %103, %cst_46 [0] : vector<8x128xf32> to vector<128xf32>
    %105 = vector.shape_cast %104 : vector<128xf32> to vector<1x128xf32>
    %106 = tpu.concatenate %14, %27, %40, %53, %66, %79, %92, %105 in 0 : vector<1x128xf32>, vector<1x128xf32>, vector<1x128xf32>, vector<1x128xf32>, vector<1x128xf32>, vector<1x128xf32>, vector<1x128xf32>, vector<1x128xf32> -> vector<8x128xf32>
    %107 = arith.truncf %106 : vector<8x128xf32> to vector<8x128xbf16>
    %c0_47 = arith.constant 0 : index
    %c0_48 = arith.constant 0 : index
    %108 = vector.load %arg3[%c0_47, %c0_48] : memref<640x128xbf16, #tpu.memory_space<vmem>>, vector<128x128xbf16>
    %cst_49 = arith.constant dense<0.000000e+00> : vector<8x128xf32>
    %109 = tpu.matmul %107, %108, %cst_49 {dimension_numbers = #tpu.dot_dimension_numbers<[1], [0], [0], [1], [0, 0, 1, 1], [], []>} : vector<8x128xbf16>, vector<128x128xbf16>, vector<8x128xf32> -> vector<8x128xf32>
    %c0_50 = arith.constant 0 : index
    %c0_51 = arith.constant 0 : index
    %110 = vector.load %arg4[%c0_50, %c0_51] : memref<8x128xf32, #tpu.memory_space<vmem>>, vector<1x128xf32>
    %111 = vector.broadcast %110 : vector<1x128xf32> to vector<8x128xf32>
    %112 = arith.addf %109, %111 : vector<8x128xf32>
    %cst_52 = arith.constant 0.000000e+00 : f32
    %113 = vector.broadcast %cst_52 : f32 to vector<8x128xf32>
    %114 = arith.cmpf ogt, %112, %113 : vector<8x128xf32>
    %cst_53 = arith.constant 3.000000e-01 : f32
    %115 = vector.broadcast %cst_53 : f32 to vector<8x128xf32>
    %116 = arith.mulf %115, %112 : vector<8x128xf32>
    %117 = arith.select %114, %112, %116 : vector<8x128xi1>, vector<8x128xf32>
    %cst_54 = arith.constant 0.000000e+00 : f32
    %118 = vector.broadcast %cst_54 : f32 to vector<8x128xf32>
    %119 = arith.cmpf ogt, %106, %118 : vector<8x128xf32>
    %cst_55 = arith.constant 3.000000e-01 : f32
    %120 = vector.broadcast %cst_55 : f32 to vector<8x128xf32>
    %121 = arith.mulf %120, %106 : vector<8x128xf32>
    %122 = arith.select %119, %106, %121 : vector<8x128xi1>, vector<8x128xf32>
    %123 = arith.truncf %117 : vector<8x128xf32> to vector<8x128xbf16>
    %c128 = arith.constant 128 : index
    %c0_56 = arith.constant 0 : index
    %124 = vector.load %arg3[%c128, %c0_56] : memref<640x128xbf16, #tpu.memory_space<vmem>>, vector<128x128xbf16>
    %cst_57 = arith.constant dense<0.000000e+00> : vector<8x128xf32>
    %125 = tpu.matmul %123, %124, %cst_57 {dimension_numbers = #tpu.dot_dimension_numbers<[1], [0], [0], [1], [0, 0, 1, 1], [], []>} : vector<8x128xbf16>, vector<128x128xbf16>, vector<8x128xf32> -> vector<8x128xf32>
    %126 = arith.truncf %122 : vector<8x128xf32> to vector<8x128xbf16>
    %c256 = arith.constant 256 : index
    %c0_58 = arith.constant 0 : index
    %127 = vector.load %arg3[%c256, %c0_58] : memref<640x128xbf16, #tpu.memory_space<vmem>>, vector<128x128xbf16>
    %cst_59 = arith.constant dense<0.000000e+00> : vector<8x128xf32>
    %128 = tpu.matmul %126, %127, %cst_59 {dimension_numbers = #tpu.dot_dimension_numbers<[1], [0], [0], [1], [0, 0, 1, 1], [], []>} : vector<8x128xbf16>, vector<128x128xbf16>, vector<8x128xf32> -> vector<8x128xf32>
    %129 = arith.addf %125, %128 : vector<8x128xf32>
    %c1_60 = arith.constant 1 : index
    %c0_61 = arith.constant 0 : index
    %130 = vector.load %arg4[%c1_60, %c0_61] : memref<8x128xf32, #tpu.memory_space<vmem>>, vector<1x128xf32>
    %131 = vector.broadcast %130 : vector<1x128xf32> to vector<8x128xf32>
    %132 = arith.addf %129, %131 : vector<8x128xf32>
    %cst_62 = arith.constant 0.000000e+00 : f32
    %133 = vector.broadcast %cst_62 : f32 to vector<8x128xf32>
    %134 = arith.cmpf ogt, %132, %133 : vector<8x128xf32>
    %cst_63 = arith.constant 3.000000e-01 : f32
    %135 = vector.broadcast %cst_63 : f32 to vector<8x128xf32>
    %136 = arith.mulf %135, %132 : vector<8x128xf32>
    %137 = arith.select %134, %132, %136 : vector<8x128xi1>, vector<8x128xf32>
    %138 = arith.truncf %137 : vector<8x128xf32> to vector<8x128xbf16>
    %c384 = arith.constant 384 : index
    %c0_64 = arith.constant 0 : index
    %139 = vector.load %arg3[%c384, %c0_64] : memref<640x128xbf16, #tpu.memory_space<vmem>>, vector<128x128xbf16>
    %cst_65 = arith.constant dense<0.000000e+00> : vector<8x128xf32>
    %140 = tpu.matmul %138, %139, %cst_65 {dimension_numbers = #tpu.dot_dimension_numbers<[1], [0], [0], [1], [0, 0, 1, 1], [], []>} : vector<8x128xbf16>, vector<128x128xbf16>, vector<8x128xf32> -> vector<8x128xf32>
    %c2_66 = arith.constant 2 : index
    %c0_67 = arith.constant 0 : index
    %141 = vector.load %arg4[%c2_66, %c0_67] : memref<8x128xf32, #tpu.memory_space<vmem>>, vector<1x128xf32>
    %142 = vector.broadcast %141 : vector<1x128xf32> to vector<8x128xf32>
    %143 = arith.addf %140, %142 : vector<8x128xf32>
    %cst_68 = arith.constant 0.000000e+00 : f32
    %144 = vector.broadcast %cst_68 : f32 to vector<8x128xf32>
    %145 = arith.cmpf ogt, %143, %144 : vector<8x128xf32>
    %cst_69 = arith.constant 3.000000e-01 : f32
    %146 = vector.broadcast %cst_69 : f32 to vector<8x128xf32>
    %147 = arith.mulf %146, %143 : vector<8x128xf32>
    %148 = arith.select %145, %143, %147 : vector<8x128xi1>, vector<8x128xf32>
    %149 = arith.truncf %148 : vector<8x128xf32> to vector<8x128xbf16>
    %c512 = arith.constant 512 : index
    %c0_70 = arith.constant 0 : index
    %150 = vector.load %arg3[%c512, %c0_70] : memref<640x128xbf16, #tpu.memory_space<vmem>>, vector<128x128xbf16>
    %cst_71 = arith.constant dense<0.000000e+00> : vector<8x128xf32>
    %151 = tpu.matmul %149, %150, %cst_71 {dimension_numbers = #tpu.dot_dimension_numbers<[1], [0], [0], [1], [0, 0, 1, 1], [], []>} : vector<8x128xbf16>, vector<128x128xbf16>, vector<8x128xf32> -> vector<8x128xf32>
    %c3_72 = arith.constant 3 : index
    %c0_73 = arith.constant 0 : index
    %152 = vector.load %arg4[%c3_72, %c0_73] : memref<8x128xf32, #tpu.memory_space<vmem>>, vector<1x128xf32>
    %153 = vector.broadcast %152 : vector<1x128xf32> to vector<8x128xf32>
    %154 = arith.addf %151, %153 : vector<8x128xf32>
    %155 = tpu.iota {dimensions = array<i32: 1>} : vector<8x128xi32>
    %c8_i32_74 = arith.constant 8 : i32
    %156 = vector.broadcast %c8_i32_74 : i32 to vector<8x128xi32>
    %157 = arith.cmpi slt, %155, %156 : vector<8x128xi32>
    %cst_75 = arith.constant 0.000000e+00 : f32
    %158 = vector.broadcast %cst_75 : f32 to vector<8x128xf32>
    %159 = arith.select %157, %154, %158 : vector<8x128xi1>, vector<8x128xf32>
    %cst_76 = arith.constant dense<0.000000e+00> : vector<8xf32>
    %160 = vector.multi_reduction <add>, %159, %cst_76 [1] : vector<8x128xf32> to vector<8xf32>
    %161 = vector.shape_cast %160 : vector<8xf32> to vector<8x1xf32>
    %cst_77 = arith.constant 1.250000e-01 : f32
    %162 = vector.broadcast %cst_77 : f32 to vector<8x1xf32>
    %163 = arith.mulf %161, %162 : vector<8x1xf32>
    %c8_i32_78 = arith.constant 8 : i32
    %164 = vector.broadcast %c8_i32_78 : i32 to vector<8x128xi32>
    %165 = arith.cmpi eq, %155, %164 : vector<8x128xi32>
    %cst_79 = arith.constant 0.000000e+00 : f32
    %166 = vector.broadcast %cst_79 : f32 to vector<8x128xf32>
    %167 = arith.select %165, %154, %166 : vector<8x128xi1>, vector<8x128xf32>
    %cst_80 = arith.constant dense<0.000000e+00> : vector<8xf32>
    %168 = vector.multi_reduction <add>, %167, %cst_80 [1] : vector<8x128xf32> to vector<8xf32>
    %169 = vector.shape_cast %168 : vector<8xf32> to vector<8x1xf32>
    %c8_i32_81 = arith.constant 8 : i32
    %170 = vector.broadcast %c8_i32_81 : i32 to vector<8x128xi32>
    %171 = arith.cmpi slt, %155, %170 : vector<8x128xi32>
    %172 = vector.broadcast %163 : vector<8x1xf32> to vector<8x128xf32>
    %173 = arith.subf %159, %172 : vector<8x128xf32>
    %174 = vector.broadcast %169 : vector<8x1xf32> to vector<8x128xf32>
    %175 = arith.addf %173, %174 : vector<8x128xf32>
    %cst_82 = arith.constant 0.000000e+00 : f32
    %176 = vector.broadcast %cst_82 : f32 to vector<8x128xf32>
    %177 = arith.select %171, %175, %176 : vector<8x128xi1>, vector<8x128xf32>
    %c0_83 = arith.constant 0 : index
    %c0_84 = arith.constant 0 : index
    %178 = vector.load %arg5[%c0_83, %c0_84] : memref<8x128xf32, #tpu.memory_space<vmem>>, vector<8x128xf32>
    tpu.vector_store %arg5[%c0_83, %c0_84], %177 {strides = array<i32>} : memref<8x128xf32, #tpu.memory_space<vmem>>, vector<8x128xf32>,
    return
  }
  func.func @transform_0(%arg0: i32) -> i32 {
    %c0_i32 = arith.constant 0 : i32
    %c0_i32_0 = arith.constant 0 : i32
    return %c0_i32 : i32
  }
  func.func @transform_1(%arg0: i32) -> (i32, i32, i32) {
    %c0_i32 = arith.constant 0 : i32
    %c0_i32_0 = arith.constant 0 : i32
    %c0_i32_1 = arith.constant 0 : i32
    return %arg0, %c0_i32, %c0_i32_0 : i32, i32, i32
  }
  func.func @transform_2(%arg0: i32) -> (i32, i32) {
    %c0_i32 = arith.constant 0 : i32
    %c0_i32_0 = arith.constant 0 : i32
    %c0_i32_1 = arith.constant 0 : i32
    return %c0_i32, %c0_i32_0 : i32, i32
  }
  func.func @transform_3(%arg0: i32) -> (i32, i32) {
    %c0_i32 = arith.constant 0 : i32
    %c0_i32_0 = arith.constant 0 : i32
    %c0_i32_1 = arith.constant 0 : i32
    return %c0_i32, %c0_i32_0 : i32, i32
  }
  func.func @transform_4(%arg0: i32) -> (i32, i32) {
    %c0_i32 = arith.constant 0 : i32
    %c0_i32_0 = arith.constant 0 : i32
    return %arg0, %c0_i32 : i32, i32
  }
}

</mosaic_0001>

<bundles_post_ra>
// kernel: tpu_custom_call.1
= control target key start
LH: loop header
LB: loop body
LE: loop exit
PB: predicated region body
PF: predicated region fallthrough
CT: control target
= control target key end

     0   :  { %9 = vsyncpa [#allocation5], 0  ;;  %s1101_s0 = inlined_call_operand.hbm [shape: s32[8], index: 0, kind: input, shape index: {}]   ;;  %s1102_s1 = inlined_call_operand.hbm [shape: f32[8,8,128], index: 1, kind: input, shape index: {}]   ;;  %s1103_s2 = inlined_call_operand.hbm [shape: bf16[640,128], index: 2, kind: input, shape index: {}]   ;;  %s1104_s3 = inlined_call_operand.hbm [shape: f32[8,128], index: 3, kind: input, shape index: {}]   ;;  %s1105_s4 = inlined_call_operand.hbm [shape: f32[8,128], index: 4, kind: output, shape index: {}]  }
   0x1   :  { %10 = vsyncpa [#allocation3], 0 }
   0x2   :  { %11 = vsyncpa [#allocation8], 0  ;;  %s39_s17 = sshll.u32 %s1103_s2, 4  ;;  %s40_s17 = int_to_ptr.hbm [resolvable:$true] %s39_s17 }
   0x3   :  { %12 = vsyncpa [#allocation4], 0  ;;  %s1008_s18 = smov [#allocation7]   ;;  %s18_s22 = sshll.u32 %s1101_s0, 4  ;;  %s19_s22 = int_to_ptr.hbm [resolvable:$true] %s18_s22 }
   0x4   :  { %s41_s19 = sshll.u32 %s1008_s18, 4  ;;  %s1009_s23 = smov 64   ;;  %s42_s19 = int_to_ptr.vmem [resolvable:$true] %s41_s19 }
   0x5   :  { %s1010_s24 = smov 4   ;;  %s1011_s25 = smov [#allocation2]  }
   0x6   :  { %47 = dma.hbm_to_vmem [thread:$0]  %s40_s17, 5120, %s42_s19, [#allocation8], %s1009_s23, %s1009_s23, %s1010_s24  }
   0x7   :  { %21 = dma.hbm_to_smem %s19_s22, 16, %s1011_s25, [#allocation5]  }
   0x8   :  { %s26_s28 = sshll.u32 %s1102_s1, 4  ;;  %s1012_s2 = smov [#allocation6]   ;;  %s27_s28 = int_to_ptr.hbm [resolvable:$true] %s26_s28 }
   0x9   :  { %s28_s29 = sshll.u32 %s1012_s2, 4  ;;  %s53_s6 = sshll.u32 %s1104_s3, 4  ;;  %s29_s29 = int_to_ptr.vmem [resolvable:$true] %s28_s29  ;;  %s54_s6 = int_to_ptr.hbm [resolvable:$true] %s53_s6 }
   0xa   :  { %s1013_s7 = smov 128   ;;  %s1014_s0 = smov 8  }
   0xb   :  { %34 = dma.hbm_to_vmem [thread:$0]  %s27_s28, 1024, %s29_s29, [#allocation3], %s1013_s7, %s1013_s7, %s1014_s0  }
   0xc   :  { %s1015_s8 = smov [#allocation9]  }
   0xd   :  { %s55_s9 = sshll.u32 %s1015_s8, 4  ;;  %s56_s9 = int_to_ptr.vmem [resolvable:$true] %s55_s9 }
   0xe   :  { %58 = dma.hbm_to_vmem [thread:$0]  %s54_s6, 128, %s56_s9, [#allocation8]  }
   0xf   :  { %1000 = dma.done.wait [#allocation5], 16  }
  0x10   :  { %1001 = vsyncadd [#allocation5], 4294967280 }
  0x11   :  { %1002 = dma.done.wait [#allocation3], 1024  }
  0x12   :  { %1003 = vsyncadd [#allocation3], 4294966272 }
  0x13   :  { %1004 = dma.done.wait [#allocation8], 5248  }
  0x14   :  { %1005 = vsyncadd [#allocation8], 4294962048 }
  0x15   :  { %75 = sfence }
  0x16   :  { %v846_v0 = vld [vmem:[#allocation7 + $0x38] sm:$0xff]  ;;  %s79_s1 = sld [smem:[#allocation2]]  ;;  %v845_v1 = vld [vmem:[#allocation7 + $0x30] sm:$0xff]  ;;  %v77_v2 = vlaneseq  ;;  %v844_v3 = vld [vmem:[#allocation7 + $0x28] sm:$0xff]  ;;  %vm205_vm4 = vcmask 1040384   ;;  %vm207_vm8 = vcmask 1041408  }
  0x17   :  { %s665_s10 = sld [smem:[#allocation2 + $0x1]]  ;;  %286 = vmatpush.bf16.msra.mxu0 %v846_v0  ;;  %v843_v5 = vld [vmem:[#allocation7 + $0x20] sm:$0xff]  ;;  %v99_v8 = vld [vmem:[#allocation6 + $0x8] sm:$0xff]  ;;  %v842_v11 = vld [vmem:[#allocation7 + $0x18] sm:$0xff]  ;;  %vm209_vm9 = vcmask 1042432   ;;  %vm211_vm11 = vcmask 1043456  }
  0x18   :  { %s1054_s3 = sld [smem:[#allocation2 + $0x2]]  ;;  %v1065_v4 = vshrl.u32 %v77_v2, 7  ;;  %v83_v6 = vld [vmem:[#allocation6] sm:$0xff]  ;;  %v115_v14 = vld [vmem:[#allocation6 + $0x10] sm:$0xff]  ;;  %v131_v17 = vld [vmem:[#allocation6 + $0x18] sm:$0xff]  ;;  %vm213_vm12 = vcmask 1044480  }
  0x19   :  { %s1056_s11 = sld [smem:[#allocation2 + $0x3]]  ;;  %v862_v20 = vld [vmem:[#allocation7 + $0xb8] sm:$0xff]  ;;  %v841_v22 = vld [vmem:[#allocation7 + $0x10] sm:$0xff]  ;;  %v147_v25 = vld [vmem:[#allocation6 + $0x20] sm:$0xff]  ;;  %vm215_vm13 = vcmask 1045504   ;;  %vm217_vm14 = vcmask 1046528  }
  0x1a   :  { %s1058_s12 = sld [smem:[#allocation2 + $0x4]]  ;;  %v854_v21 = vld [vmem:[#allocation7 + $0x78] sm:$0xff]  ;;  %v163_v26 = vld [vmem:[#allocation6 + $0x28] sm:$0xff]  ;;  %387 = vmatpush.bf16.msra.mxu1 %v862_v20  ;;  %v861_v30 = vld [vmem:[#allocation7 + $0xb0] sm:$0xff]  ;;  %s1016_s25 = smov [#allocation10]  }
  0x1b   :  { %s1060_s13 = sld [smem:[#allocation2 + $0x5]]  ;;  %287 = vmatpush.bf16.msra.mxu0 %v845_v1  ;;  %448 = vmatpush.bf16.msra.mxu2 %v854_v21  ;;  %v853_v34 = vld [vmem:[#allocation7 + $0x70] sm:$0xff]  ;;  %v840_v38 = vld [vmem:[#allocation7 + $0x8] sm:$0xff]  ;;  %v839_v60 = vld [vmem:[#allocation7] sm:$0xff]  ;;  %s650_s26 = sshll.u32 %s1016_s25, 4  ;;  %s651_s26 = int_to_ptr.vmem [resolvable:$true] %s650_s26 }
  0x1c   :  { %s664_s14 = sadd.s32 4294967295, %s79_s1  ;;  %s1062_s15 = sld [smem:[#allocation2 + $0x6]]  ;;  %v179_v46 = vld [vmem:[#allocation6 + $0x30] sm:$0xff]  ;;  %v860_v47 = vld [vmem:[#allocation7 + $0xa8] sm:$0xff]  ;;  %v859_v0 = vld [vmem:[#allocation7 + $0xa0] sm:$0xff] }
  0x1d   :  { %p81_p0 = scmp.gt.s32.totalorder %s664_s14, 0  ;;  %s666_s16 = sadd.s32 4294967295, %s665_s10  ;;  %v852_v52 = vld [vmem:[#allocation7 + $0x68] sm:$0xff] }
  0x1e   :  { %p96_p1 = scmp.gt.s32.totalorder %s666_s16, 0  ;;  %s668_s17 = sadd.s32 4294967295, %s1054_s3  ;;  %388 = vmatpush.bf16.msra.mxu1 %v861_v30 }
  0x1f   :  { %s1108_s14 = smov (!%p81_p0, %s664_s14), 0  ;;  %288 = vmatpush.bf16.msra.mxu0 %v844_v3  ;;  %p112_p2 = scmp.gt.s32.totalorder %s668_s17, 0  ;;  %449 = vmatpush.bf16.msra.mxu2 %v853_v34 }
  0x20   :  { %s1110_s16 = smov (!%p96_p1, %s666_s16), 0  ;;  %v84_v7 = vstv %s1108_s14  ;;  %s670_s18 = sadd.s32 4294967295, %s1056_s11 }
  0x21   :  { %vm85_vm0 = vcmp.eq.s32.totalorder %v1065_v4, %v84_v7  ;;  %v100_v9 = vstv %s1110_s16  ;;  %p128_p3 = scmp.gt.s32.totalorder %s670_s18, 0  ;;  %s672_s19 = sadd.s32 4294967295, %s1058_s12 }
  0x22   :  { %v86_v10 = vsel %vm85_vm0, %v83_v6, 0.0  ;;  %vm101_vm1 = vcmp.eq.s32.totalorder %v1065_v4, %v100_v9  ;;  %s1112_s17 = smov (!%p112_p2, %s668_s17), 0  ;;  %p144_p4 = scmp.gt.s32.totalorder %s672_s19, 0  ;;  %389 = vmatpush.bf16.msra.mxu1 %v860_v47  ;;  %v851_v6 = vld [vmem:[#allocation7 + $0x60] sm:$0xff]  ;;  %v869_v47 = vld [vmem:[#allocation7 + $0xf0] sm:$0xff] }
  0x23   :  { %289 = vmatpush.bf16.msra.mxu0 %v843_v5  ;;  %v87_v12 = vrot.slane %v86_v10, 4  ;;  %v102_v13 = vsel %vm101_vm1, %v99_v8, 0.0  ;;  %s1114_s18 = smov (!%p128_p3, %s670_s18), 0  ;;  %v116_v16 = vstv %s1112_s17  ;;  %s674_s20 = sadd.s32 4294967295, %s1060_s13  ;;  %450 = vmatpush.bf16.msra.mxu2 %v852_v52 }
  0x24   :  { %v103_v15 = vrot.slane %v102_v13, 4  ;;  %vm117_vm2 = vcmp.eq.s32.totalorder %v1065_v4, %v116_v16  ;;  %v132_v19 = vstv %s1114_s18  ;;  %p1074_p5 = scmp.gt.s32.totalorder %s674_s20, 0  ;;  %s676_s22 = sadd.s32 4294967295, %s1062_s15 }
  0x25   :  { %v88_v18 = vadd.f32 %v87_v12, %v86_v10  ;;  %v118_v24 = vsel %vm117_vm2, %v115_v14, 0.0  ;;  %vm133_vm3 = vcmp.eq.s32.totalorder %v1065_v4, %v132_v19  ;;  %s1116_s19 = smov (!%p144_p4, %s672_s19), 0  ;;  %p176_p6 = scmp.gt.s32.totalorder %s676_s22, 0  ;;  %v195_v12 = vld [vmem:[#allocation6 + $0x38] sm:$0xff] }
  0x26   :  { %v104_v23 = vadd.f32 %v103_v15, %v102_v13  ;;  %v119_v28 = vrot.slane %v118_v24, 4  ;;  %v134_v29 = vsel %vm133_vm3, %v131_v17, 0.0  ;;  %s1118_s20 = smov (!%p1074_p5, %s674_s20), 0  ;;  %v148_v33 = vstv %s1116_s19  ;;  %s1084_s23 = sld [smem:[#allocation2 + $0x7]]  ;;  %390 = vmatpush.bf16.msra.mxu1 %v859_v0  ;;  %v858_v17 = vld [vmem:[#allocation7 + $0x98] sm:$0xff]  ;;  %v877_v0 = vld [vmem:[#allocation7 + $0x130] sm:$0xff] }
  0x27   :  { %290 = vmatpush.bf16.msra.mxu0 %v842_v11  ;;  %v89_v27 = vrot.slane %v88_v18, 2  ;;  %v135_v32 = vrot.slane %v134_v29, 4  ;;  %vm149_vm5 = vcmp.eq.s32.totalorder %v1065_v4, %v148_v33  ;;  %v164_v37 = vstv %s1118_s20  ;;  %s1120_s22 = smov (!%p176_p6, %s676_s22), 0  ;;  %451 = vmatpush.bf16.msra.mxu2 %v851_v6  ;;  %v850_v19 = vld [vmem:[#allocation7 + $0x58] sm:$0xff]  ;;  %v873_v6 = vld [vmem:[#allocation7 + $0x110] sm:$0xff]  ;;  %s652_s2 = sshll.u32 %s1105_s4, 4  ;;  %s653_s2 = int_to_ptr.hbm [resolvable:$true] %s652_s2 }
  0x28   :  { %v105_v31 = vrot.slane %v104_v23, 2  ;;  %v120_v36 = vadd.f32 %v119_v28, %v118_v24  ;;  %v150_v41 = vsel %vm149_vm5, %v147_v25, 0.0  ;;  %vm165_vm6 = vcmp.eq.s32.totalorder %v1065_v4, %v164_v37 }
  0x29   :  { %v90_v35 = vadd.f32 %v89_v27, %v88_v18  ;;  %v136_v40 = vadd.f32 %v135_v32, %v134_v29  ;;  %v151_v44 = vrot.slane %v150_v41, 4  ;;  %v166_v45 = vsel %vm165_vm6, %v163_v26, 0.0  ;;  %v857_v26 = vld [vmem:[#allocation7 + $0x90] sm:$0xff]  ;;  %v856_v32 = vld [vmem:[#allocation7 + $0x88] sm:$0xff] }
  0x2a   :  { %v106_v39 = vadd.f32 %v105_v31, %v104_v23  ;;  %v121_v43 = vrot.slane %v120_v36, 2  ;;  %v167_v50 = vrot.slane %v166_v45, 4  ;;  %v180_v51 = vstv %s1120_s22  ;;  %391 = vmatpush.bf16.msra.mxu1 %v858_v17  ;;  %v849_v29 = vld [vmem:[#allocation7 + $0x50] sm:$0xff]  ;;  %v890_v17 = vld [vmem:[#allocation9 + $0x2] ss:$0 sm:$0xff] }
  0x2b   :  { %291 = vmatpush.bf16.msra.mxu0 %v841_v22  ;;  %v91_v42 = vrot.slane %v90_v35, 1  ;;  %v137_v49 = vrot.slane %v136_v40, 2  ;;  %v152_v55 = vadd.f32 %v151_v44, %v150_v41  ;;  %vm181_vm7 = vcmp.eq.s32.totalorder %v1065_v4, %v180_v51  ;;  %452 = vmatpush.bf16.msra.mxu2 %v850_v19  ;;  %v855_v41 = vld [vmem:[#allocation7 + $0x80] sm:$0xff] }
  0x2c   :  { %v107_v48 = vrot.slane %v106_v39, 1  ;;  %v122_v54 = vadd.f32 %v121_v43, %v120_v36  ;;  %v168_v58 = vadd.f32 %v167_v50, %v166_v45  ;;  %v182_v59 = vsel %vm181_vm7, %v179_v46, 0.0  ;;  %s678_s24 = sadd.s32 4294967295, %s1084_s23  ;;  %v847_v43 = vld [vmem:[#allocation7 + $0x40] sm:$0xff]  ;;  %v870_v46 = vld [vmem:[#allocation7 + $0xf8] sm:$0xff] }
  0x2d   :  { %v92_v53 = vadd.f32 %v91_v42, %v90_v35  ;;  %v138_v57 = vadd.f32 %v137_v49, %v136_v40  ;;  %v153_v62 = vrot.slane %v152_v55, 2  ;;  %v183_v63 = vrot.slane %v182_v59, 4  ;;  %p192_p7 = scmp.gt.s32.totalorder %s678_s24, 0  ;;  %v848_v40 = vld [vmem:[#allocation7 + $0x48] sm:$0xff]  ;;  %534 = vmatpush.bf16.msra.mxu3 %v870_v46  ;;  %v867_v49 = vld [vmem:[#allocation7 + $0xe0] sm:$0xff] }
  0x2e   :  { %v108_v56 = vadd.f32 %v107_v48, %v106_v39  ;;  %v123_v61 = vrot.slane %v122_v54, 1  ;;  %v169_v3 = vrot.slane %v168_v58, 2  ;;  %392 = vmatpush.bf16.msra.mxu1 %v857_v26  ;;  %v868_v48 = vld [vmem:[#allocation7 + $0xe8] sm:$0xff]  ;;  %v888_v50 = vld [vmem:[#allocation9] ss:$0 sm:$0xff] }
  0x2f   :  { %292 = vmatpush.bf16.msra.mxu0 %v840_v38  ;;  %v139_v1 = vrot.slane %v138_v57, 1  ;;  %v154_v8 = vadd.f32 %v153_v62, %v152_v55  ;;  %v184_v9 = vadd.f32 %v183_v63, %v182_v59  ;;  %s1122_s24 = smov (!%p192_p7, %s678_s24), 0  ;;  %453 = vmatpush.bf16.msra.mxu2 %v849_v29  ;;  %v863_v62 = vld [vmem:[#allocation7 + $0xc0] sm:$0xff]  ;;  %v878_v63 = vld [vmem:[#allocation7 + $0x138] sm:$0xff] }
  0x30   :  { %v206_v5 = vsel %vm205_vm4, %v92_v53, %v108_v56  ;;  %v124_v7 = vadd.f32 %v123_v61, %v122_v54  ;;  %v170_v11 = vadd.f32 %v169_v3, %v168_v58  ;;  %v196_v15 = vstv %s1122_s24  ;;  %v865_v58 = vld [vmem:[#allocation7 + $0xd0] sm:$0xff]  ;;  %v864_v61 = vld [vmem:[#allocation7 + $0xc8] sm:$0xff]  ;;  %v875_v3 = vld [vmem:[#allocation7 + $0x120] sm:$0xff] }
  0x31   :  { %v140_v10 = vadd.f32 %v139_v1, %v138_v57  ;;  %v155_v13 = vrot.slane %v154_v8, 1  ;;  %v185_v14 = vrot.slane %v184_v9, 2  ;;  %vm197_vm10 = vcmp.eq.s32.totalorder %v1065_v4, %v196_v15  ;;  %535 = vmatpush.bf16.msra.mxu3 %v869_v47  ;;  %v866_v57 = vld [vmem:[#allocation7 + $0xd8] sm:$0xff]  ;;  %v876_v1 = vld [vmem:[#allocation7 + $0x128] sm:$0xff] }
  0x32   :  { %v208_v16 = vsel %vm207_vm8, %v206_v5, %v124_v7  ;;  %v171_v18 = vrot.slane %v170_v11, 1  ;;  %v198_v22 = vsel %vm197_vm10, %v195_v12, 0.0  ;;  %393 = vmatpush.bf16.msra.mxu1 %v856_v32  ;;  %v874_v5 = vld [vmem:[#allocation7 + $0x118] sm:$0xff]  ;;  %v889_v7 = vld [vmem:[#allocation9 + $0x1] ss:$0 sm:$0xff]  ;;  %v872_v15 = vld [vmem:[#allocation7 + $0x108] sm:$0xff] }
  0x33   :  { %293 = vmatpush.bf16.msra.mxu0 %v839_v60  ;;  %v156_v20 = vadd.f32 %v155_v13, %v154_v8  ;;  %v186_v21 = vadd.f32 %v185_v14, %v184_v9  ;;  %v199_v23 = vrot.slane %v198_v22, 4  ;;  %v210_v24 = vsel %vm209_vm9, %v208_v16, %v140_v10  ;;  %454 = vmatpush.bf16.msra.mxu2 %v848_v40  ;;  %v871_v16 = vld [vmem:[#allocation7 + $0x100] sm:$0xff] }
  0x34   :  { %v172_v27 = vadd.f32 %v171_v18, %v170_v11 }
  0x35   :  { %v187_v25 = vrot.slane %v186_v21, 1  ;;  %v200_v28 = vadd.f32 %v199_v23, %v198_v22  ;;  %v212_v30 = vsel %vm211_vm11, %v210_v24, %v156_v20  ;;  %536 = vmatpush.bf16.msra.mxu3 %v868_v48  ;;  %v631_v24 = vand.u32 127, %v77_v2 }
  0x36   :  { %v214_v34 = vsel %vm213_vm12, %v212_v30, %v172_v27  ;;  %394 = vmatpush.bf16.msra.mxu1 %v855_v41 }
  0x37   :  { %v201_v31 = vrot.slane %v200_v28, 2  ;;  %v188_v4 = vadd.f32 %v187_v25, %v186_v21  ;;  %455 = vmatpush.bf16.msra.mxu2 %v847_v43  ;;  %617 = vmatpush.bf16.msrb.mxu0 %v878_v63  ;;  %v891_v25 = vld [vmem:[#allocation9 + $0x3] ss:$0 sm:$0xff]  ;;  %vm632_vm3 = vcmp.lt.s32.totalorder %v631_v24, 8  ;;  %vm637_vm4 = vcmp.eq.s32.totalorder %v631_v24, 8 }
  0x39   :  { %v202_v33 = vadd.f32 %v201_v31, %v200_v28  ;;  %v216_v36 = vsel %vm215_vm13, %v214_v34, %v188_v4  ;;  %537 = vmatpush.bf16.msra.mxu3 %v867_v49 }
  0x3b   :  { %v203_v35 = vrot.slane %v202_v33, 1  ;;  %618 = vmatpush.bf16.msrb.mxu0 %v877_v0 }
  0x3d   :  { %v204_v37 = vadd.f32 %v203_v35, %v202_v33  ;;  %538 = vmatpush.bf16.msra.mxu3 %v866_v57 }
  0x3f   :  { %v218_v38 = vsel %vm217_vm14, %v216_v36, %v204_v37  ;;  %619 = vmatpush.bf16.msrb.mxu0 %v876_v1 }
  0x40   :  { %v219_v39 = vpack.c.bf16 %v218_v38, %v218_v38  ;;  %v303_v42 = vmul.f32 0.3, %v218_v38  ;;  %vm302_vm15 = vcmp.gt.f32.partialorder %v218_v38, 0.0 }
  0x41   :  { %539 = vmatpush.bf16.msra.mxu3 %v865_v58 }
  0x42   :  { %294 = vmatmul.bf16.vlgmr.msra.gmra.mxu0 %v219_v39  ;;  %v304_v44 = vsel %vm302_vm15, %v218_v38, %v303_v42 }
  0x43   :  { %v322_v45 = vpack.c.bf16 %v304_v44, %v304_v44  ;;  %620 = vmatpush.bf16.msrb.mxu0 %v875_v3 }
  0x45   :  { %395 = vmatmul.bf16.vlgmr.msra.gmra.mxu1 %v322_v45  ;;  %540 = vmatpush.bf16.msra.mxu3 %v864_v61 }
  0x47   :  { %621 = vmatpush.bf16.msrb.mxu0 %v874_v5 }
  0x49   :  { %541 = vmatpush.bf16.msra.mxu3 %v863_v62 }
  0x4b   :  { %622 = vmatpush.bf16.msrb.mxu0 %v873_v6 }
  0x4f   :  { %623 = vmatpush.bf16.msrb.mxu0 %v872_v15 }
  0x53   :  { %624 = vmatpush.bf16.msrb.mxu0 %v871_v16 }
  0xbf   :  { %v295_v51 = vpop.f32.mrf.mxu0 }
  0xc0   :  { %v296_v52 = vadd.f32 %v888_v50, %v295_v51 }
  0xc2   :  { %v300_v53 = vmul.f32 0.3, %v296_v52  ;;  %vm299_vm0 = vcmp.gt.f32.partialorder %v296_v52, 0.0  ;;  %v396_v59 = vpop.f32.mrf.mxu1 }
  0xc4   :  { %v301_v54 = vsel %vm299_vm0, %v296_v52, %v300_v53 }
  0xc5   :  { %v305_v55 = vpack.c.bf16 %v301_v54, %v301_v54 }
  0xc7   :  { %v297_v56 = vpop.f32.mrf.mxu0  ;;  %456 = vmatmul.bf16.vlgmr.msra.gmra.mxu2 %v305_v55 }
  0xca   :  { %v398_v60 = vpop.f32.mrf.mxu1 }
 0x14a   :  { %v457_v8 = vpop.f32.mrf.mxu2 }
 0x14b   :  { %v458_v9 = vadd.f32 %v457_v8, %v396_v59 }
 0x14d   :  { %v463_v10 = vadd.f32 %v889_v7, %v458_v9 }
 0x14f   :  { %vm464_vm1 = vcmp.gt.f32.partialorder %v463_v10, 0.0  ;;  %v465_v11 = vmul.f32 0.3, %v463_v10 }
 0x151   :  { %v466_v12 = vsel %vm464_vm1, %v463_v10, %v465_v11 }
 0x152   :  { %v459_v13 = vpop.f32.mrf.mxu2  ;;  %v467_v14 = vpack.c.bf16 %v466_v12, %v466_v12 }
 0x154   :  { %542 = vmatmul.bf16.vlgmr.msra.gmra.mxu3 %v467_v14 }
 0x1d7   :  { %v543_v18 = vpop.f32.mrf.mxu3 }
 0x1d8   :  { %v544_v19 = vadd.f32 %v890_v17, %v543_v18 }
 0x1da   :  { %vm547_vm2 = vcmp.gt.f32.partialorder %v544_v19, 0.0  ;;  %v548_v20 = vmul.f32 0.3, %v544_v19 }
 0x1dc   :  { %v549_v21 = vsel %vm547_vm2, %v544_v19, %v548_v20 }
 0x1dd   :  { %v550_v22 = vpack.c.bf16 %v549_v21, %v549_v21 }
 0x1df   :  { %v545_v23 = vpop.f32.mrf.mxu3  ;;  %625 = vmatmul.bf16.vlgmr.msrb.gmra.mxu0 %v550_v22 }
 0x25c   :  { %v626_v26 = vpop.f32.mrf.mxu0 }
 0x25d   :  { %v627_v27 = vadd.f32 %v891_v25, %v626_v26 }
 0x25f   :  { %v633_v28 = vsel %vm632_vm3, %v627_v27, 0.0  ;;  %v638_v30 = vsel %vm637_vm4, %v627_v27, 0.0 }
 0x260   :  { %634 = vadd.xlane.f32.xlu0 %v633_v28 }
 0x264   :  { %v628_v29 = vpop.f32.mrf.mxu0 }
 0x268   :  { %639 = vadd.xlane.f32.xlu0 %v638_v30 }
 0x2d3   :  { %v635_v31 = vpop.xlane.xlu0 %634 }
 0x2d4   :  { %v636_v4 = vmul.f32 0.125, %v635_v31 }
 0x2d6   :  { %v641_v32 = vsub.f32 %v633_v28, %v636_v4 }
 0x2db   :  { %v640_v2 = vpop.xlane.xlu0 %639 }
 0x2dc   :  { %v642_v33 = vadd.f32 %v641_v32, %v640_v2 }
 0x2de   :  { %v643_v34 = vsel %vm632_vm3, %v642_v33, 0.0 }
 0x2df   :  { %644 = vst [vmem:[#allocation10] sm:$0xff] %v643_v34 }
 0x2e0   :  { %655 = dma.vmem_to_hbm [thread:$0]  %s651_s26, 128, %s653_s2, [#allocation4]  }
 0x2e1   :  { %1006 = dma.done.wait [#allocation4], 128  }
 0x2e2   :  { %1007 = vsyncadd [#allocation4], 4294967168 }
 0x2e3   :  { %660 = vsyncpa [#allocation3], 1 }
 0x2e4   :  { %661 = vsyncpa [#allocation8], 1 }
 0x2e5   :  { %662 = vsyncpa [#allocation4], 1 }
 0x2e6   :  { %663 = vsyncpa [#allocation5], 1 }

</bundles_post_ra>
